<compile_context>
chip_gen: v7x
topology: tpu7x:2x2x1
jax: 0.10.0
libtpu: 0.0.40
codegen_flags: <defaults>
</compile_context>

<pallas_src>
import jax
import jax.numpy as jnp
import numpy as np
from jax import lax
from jax.experimental import pallas as pl
from jax.experimental.pallas import tpu as pltpu

EPS = 1e-8


def _round_up(x, m):
    return (x + m - 1) // m * m


def _cdiv(a, b):
    return (a + b - 1) // b


def _nn(a, b):
    # [M, K] @ [K, N] -> [M, N], f32 accumulate on the MXU
    return lax.dot_general(a, b, (((1,), (0,)), ((), ())),
                           preferred_element_type=jnp.float32)


def _nt(a, b):
    # [M, K] @ [N, K]^T -> [M, N]  (NT contraction, transpose absorbed)
    return lax.dot_general(a, b, (((1,), (1,)), ((), ())),
                           preferred_element_type=jnp.float32)


def _blkdiag3(w):
    # [a, b] -> block-diagonal [3a, 3b] (one copy per spatial coordinate)
    a, b = w.shape
    out = jnp.zeros((3 * a, 3 * b), w.dtype)
    for k in range(3):
        out = out.at[k * a:(k + 1) * a, k * b:(k + 1) * b].set(w)
    return out


def _num_tensorcores():
    # Only v7x exposes 2 TensorCores per chip to a single pallas_call grid.
    try:
        kind = jax.devices()[0].device_kind.lower()
        if "v7" in kind or "7x" in kind:
            return 2
    except Exception:
        pass
    return 1


def label_pred_pallas(s, v, params, tile_n=8192, matmul_dtype=jnp.bfloat16,
                      vmem_limit_bytes=48 * 1024 * 1024):
    """s: [N, si], v: [N, vi, 3]  ->  [N, 1] float32."""
    N, si = s.shape
    vi = v.shape[1]
    assert v.shape == (N, vi, 3)
    h1, vo, h2 = vi, vi, vi          # layer-1 hidden, layer-1 vec out, layer-2 hidden
    h1p, vop, h2p = _round_up(h1, 8), _round_up(vo, 8), _round_up(h2, 8)
    C = 3 * vi
    mm = jnp.dtype(matmul_dtype) if matmul_dtype is not None else jnp.dtype(jnp.float32)
    f32 = jnp.float32

    wh1 = params["wh1"].astype(f32)   # [h1, vi]
    wv1 = params["wv1"].astype(f32)   # [vo, h1]
    ws1 = params["ws1"].astype(f32)   # [si, si + h1]
    bs1 = params["bs1"].astype(f32)   # [si]
    wh2 = params["wh2"].astype(f32)   # [h2, vo]
    ws2 = params["ws2"].astype(f32)   # [1, si + h2]
    bs2 = params["bs2"].astype(f32)   # [1]

    # ---- one-time weight prep (tiny, wrapper side) ----------------------------
    # Stacked per-coordinate wh1: one NT matmul against the flat [TN, 3*vi] tile
    # yields all three projections vh_k^T = wh1 @ v_k^T  (vf[n, i*3+k] = v[n,i,k]).
    blocks = []
    for k in range(3):
        w3 = jnp.zeros((h1, vi, 3), f32).at[:, :, k].set(wh1)
        blocks.append(jnp.pad(w3.reshape(h1, C), ((0, h1p - h1), (0, 0))))
    wh_stack = jnp.concatenate(blocks, axis=0).astype(mm)                 # [3*h1p, C]

    ws1_s = ws1[:, :si].astype(mm)                                        # [si, si]
    ws1_v = jnp.pad(ws1[:, si:si + h1], ((0, 0), (0, h1p - h1))).astype(mm)  # [si, h1p]
    b1col = bs1[:, None]                                                  # [si, 1] f32
    wv1_blk = _blkdiag3(jnp.pad(wv1, ((0, vop - vo), (0, h1p - h1)))).astype(mm)  # [3vop,3h1p]
    wh2_blk = _blkdiag3(jnp.pad(wh2, ((0, h2p - h2), (0, vop - vo)))).astype(mm)  # [3h2p,3vop]
    # ws2 padded to 8 output rows so the final matmuls are sublane-aligned;
    # only row 0 is real, rows 1..7 are zero and discarded before the store.
    ws2_s8 = jnp.zeros((8, si), f32).at[0].set(ws2[0, :si]).astype(mm)     # [8, si]
    ws2_v8 = jnp.zeros((8, h2p), f32).at[0, :h2].set(ws2[0, si:si + h2]).astype(mm)
    b2_8 = jnp.zeros((8, 1), f32).at[0, 0].set(bs2[0])                     # [8, 1] f32

    vf = v.reshape(N, C)          # free reshape of the contiguous [N, vi, 3] input

    # ---- node tiling: no padding pass; Pallas handles the ragged last block ---
    tile_n = max(128, _round_up(tile_n, 128))
    TN = min(tile_n, _round_up(N, 128))
    n_tc = _num_tensorcores()
    if n_tc > 1 and _cdiv(N, TN) < n_tc and N >= 128 * n_tc:
        # v7x: make sure the grid has >= 2 steps so the second TC is used.
        TN = max(128, _round_up(_cdiv(N, n_tc), 128))
    grid = (_cdiv(N, TN),)

    def kernel(s_ref, v_ref, whs_ref, ws1s_ref, ws1v_ref, b1_ref, wv1b_ref,
               wh2b_ref, ws2s_ref, ws2v_ref, b2_ref, out_ref):
        sx = s_ref[...].astype(mm)                        # [TN, si]
        vx = v_ref[...].astype(mm)                        # [TN, 3*vi]

        # ---------------- GVP layer 1: (si, vi) -> (si, vi) --------------------
        # All three coordinate projections in a single NT matmul -> [3*h1p, TN].
        vh = _nt(whs_ref[...], vx)
        vh0, vh1, vh2 = vh[0:h1p], vh[h1p:2 * h1p], vh[2 * h1p:3 * h1p]
        vn = jnp.sqrt(jnp.maximum(vh0 * vh0 + vh1 * vh1 + vh2 * vh2, EPS))

        # scalar path: relu( ws1 @ cat([s, vn]) + b1 )
        s1 = _nt(ws1s_ref[...], sx) + _nn(ws1v_ref[...], vn.astype(mm)) + b1_ref[...]
        s1 = jnp.maximum(s1, 0.0)                          # [si, TN]
        # contract s1 against ws2 right away; only [8, TN] stays live below
        out_s = _nn(ws2s_ref[...], s1.astype(mm))          # [8, TN]

        # vector path: one block-diagonal matmul for all three coordinates,
        # then the sigmoid norm gate.
        us = _nn(wv1b_ref[...], vh.astype(mm))             # [3*vop, TN]
        u0, u1, u2 = us[0:vop], us[vop:2 * vop], us[2 * vop:3 * vop]
        gate = jax.nn.sigmoid(jnp.sqrt(jnp.maximum(u0 * u0 + u1 * u1 + u2 * u2, EPS)))
        gated = us * jnp.concatenate([gate, gate, gate], axis=0)

        # ---------------- GVP layer 2: (si, vi) -> (1, 0) ----------------------
        a = _nn(wh2b_ref[...], gated.astype(mm))           # [3*h2p, TN]
        a0, a1, a2 = a[0:h2p], a[h2p:2 * h2p], a[2 * h2p:3 * h2p]
        vn2 = jnp.sqrt(jnp.maximum(a0 * a0 + a1 * a1 + a2 * a2, EPS))

        out = out_s + _nn(ws2v_ref[...], vn2.astype(mm)) + b2_ref[...]   # [8, TN]
        out_ref[...] = out[0:1, :].astype(out_ref.dtype)                 # [1, TN]

    row_spec = lambda w: pl.BlockSpec((TN, w), lambda i: (i, 0))
    w_spec = lambda shp: pl.BlockSpec(shp, lambda i: (0, 0))

    w_ops = [wh_stack, ws1_s, ws1_v, b1col, wv1_blk, wh2_blk, ws2_s8, ws2_v8, b2_8]
    w_bytes = sum(int(np.prod(w.shape)) * w.dtype.itemsize for w in w_ops)
    flops = 2 * N * (3 * h1p * C + si * si + si * h1p
                     + (3 * vop) * (3 * h1p) + (3 * h2p) * (3 * vop)
                     + 8 * si + 8 * h2p)
    cost = pl.CostEstimate(
        flops=int(flops),
        transcendentals=int(N * (h1p + 2 * vop + h2p)),
        bytes_accessed=int(N * (si * s.dtype.itemsize + C * v.dtype.itemsize)
                           + N * 4 + w_bytes),
    )

    out = pl.pallas_call(
        kernel,
        out_shape=jax.ShapeDtypeStruct((1, N), jnp.float32),
        grid=grid,
        in_specs=[
            row_spec(si),                   # s tile
            row_spec(C),                    # v tile (flat [N, 3*vi])
            w_spec((3 * h1p, C)),           # stacked per-coordinate wh1
            w_spec((si, si)),               # ws1 (scalar half)
            w_spec((si, h1p)),              # ws1 (vector-norm half, padded)
            w_spec((si, 1)),                # bs1
            w_spec((3 * vop, 3 * h1p)),     # block-diag wv1
            w_spec((3 * h2p, 3 * vop)),     # block-diag wh2
            w_spec((8, si)),                # ws2 (scalar half, row-padded)
            w_spec((8, h2p)),               # ws2 (vector-norm half, padded)
            w_spec((8, 1)),                 # bs2 (row-padded)
        ],
        out_specs=pl.BlockSpec((1, TN), lambda i: (0, i)),
        compiler_params=pltpu.CompilerParams(
            dimension_semantics=("parallel",),
            vmem_limit_bytes=int(vmem_limit_bytes)),
        cost_estimate=cost,
    )(s, vf, wh_stack, ws1_s, ws1_v, b1col, wv1_blk, wh2_blk, ws2_s8, ws2_v8, b2_8)

    return out[0, :, None]                                 # [N, 1]


# ---------------- pure-JAX reference (mirrors the torch code) ----------------
def label_pred_ref(s, v, p):
    def norm_no_nan(x, axis, keepdims=False):
        return jnp.sqrt(jnp.maximum(jnp.sum(x * x, axis=axis, keepdims=keepdims), EPS))

    s = s.astype(jnp.float32)
    v = v.astype(jnp.float32)
    # layer 1
    vt = jnp.swapaxes(v, -1, -2)                       # [N, 3, vi]
    vh = vt @ p["wh1"].T                               # [N, 3, h1]
    vn = norm_no_nan(vh, axis=-2)                      # [N, h1]
    s1 = jnp.concatenate([s, vn], -1) @ p["ws1"].T + p["bs1"]
    v1 = vh @ p["wv1"].T                               # [N, 3, vo]
    v1 = jnp.swapaxes(v1, -1, -2)                      # [N, vo, 3]
    v1 = v1 * jax.nn.sigmoid(norm_no_nan(v1, axis=-1, keepdims=True))
    s1 = jax.nn.relu(s1)
    # layer 2
    vt2 = jnp.swapaxes(v1, -1, -2)                     # [N, 3, vo]
    vh2 = vt2 @ p["wh2"].T                             # [N, 3, h2]
    vn2 = norm_no_nan(vh2, axis=-2)                    # [N, h2]
    return jnp.concatenate([s1, vn2], -1) @ p["ws2"].T + p["bs2"]


if __name__ == "__main__":
    N, si, vi = 8, 32, 4          # in_dims = (32, 4), seq/batch N = 8
    key = jax.random.PRNGKey(0)
    ks = jax.random.split(key, 9)

    params = {
        "wh1": jax.random.normal(ks[0], (vi, vi), jnp.float32) * 0.3,        # Linear(vi, h1), no bias
        "ws1": jax.random.normal(ks[1], (si, vi + si), jnp.float32) * 0.2,   # Linear(h1+si, si)
        "bs1": jax.random.normal(ks[2], (si,), jnp.float32) * 0.1,
        "wv1": jax.random.normal(ks[3], (vi, vi), jnp.float32) * 0.3,        # Linear(h1, vi), no bias
        "wh2": jax.random.normal(ks[4], (vi, vi), jnp.float32) * 0.3,        # Linear(vi, h2), no bias
        "ws2": jax.random.normal(ks[5], (1, vi + si), jnp.float32) * 0.2,    # Linear(h2+si, 1)
        "bs2": jax.random.normal(ks[6], (1,), jnp.float32) * 0.1,
    }
    s = jax.random.normal(ks[7], (N, si), jnp.float32)
    v = jax.random.normal(ks[8], (N, vi, 3), jnp.float32)

    # 1) exact path (f32 MXU operands), tiny N -> single ragged block.
    out = jax.block_until_ready(label_pred_pallas(s, v, params, matmul_dtype=jnp.float32))
    ref = jax.block_until_ready(label_pred_ref(s, v, params))
    assert out.shape == (N, 1) and out.dtype == jnp.float32
    np.testing.assert_allclose(np.asarray(out), np.asarray(ref), rtol=2e-5, atol=2e-5)

    # 2) multi-tile grid + ragged tail block (300 = 2*128 + 44), exact path.
    N2 = 300
    s2 = jax.random.normal(jax.random.PRNGKey(1), (N2, si), jnp.float32)
    v2 = jax.random.normal(jax.random.PRNGKey(2), (N2, vi, 3), jnp.float32)
    ref2 = jax.block_until_ready(label_pred_ref(s2, v2, params))
    out2 = jax.block_until_ready(
        label_pred_pallas(s2, v2, params, tile_n=128, matmul_dtype=jnp.float32))
    assert out2.shape == (N2, 1)
    np.testing.assert_allclose(np.asarray(out2), np.asarray(ref2), rtol=2e-5, atol=2e-5)

    # 3) default fast path: bf16 HBM inputs + bf16 MXU operands (f32 accumulation),
    #    big default tile.  Looser tolerance is inherent to bf16 operands.
    out3 = jax.block_until_ready(
        label_pred_pallas(s2.astype(jnp.bfloat16), v2.astype(jnp.bfloat16), params))
    assert out3.shape == (N2, 1)
    np.testing.assert_allclose(np.asarray(out3), np.asarray(ref2), rtol=8e-2, atol=8e-2)

    print("KERNEL_OK")
</pallas_src>

<mosaic_0001>
module attributes {stable_mosaic.version = 11 : i64} {
  func.func @kernel(%arg0: i32, %arg1: memref<128x32xf32, #tpu.memory_space<vmem>>, %arg2: memref<128x12xf32, #tpu.memory_space<vmem>>, %arg3: memref<24x12xf32, #tpu.memory_space<vmem>>, %arg4: memref<32x32xf32, #tpu.memory_space<vmem>>, %arg5: memref<32x8xf32, #tpu.memory_space<vmem>>, %arg6: memref<32x1xf32, #tpu.memory_space<vmem>>, %arg7: memref<24x24xf32, #tpu.memory_space<vmem>>, %arg8: memref<24x24xf32, #tpu.memory_space<vmem>>, %arg9: memref<8x32xf32, #tpu.memory_space<vmem>>, %arg10: memref<8x8xf32, #tpu.memory_space<vmem>>, %arg11: memref<8x1xf32, #tpu.memory_space<vmem>>, %arg12: memref<1x128xf32, #tpu.memory_space<vmem>>) attributes {dimension_semantics = [#tpu.dimension_semantics<parallel>], iteration_bounds = array<i64: 1>, scalar_prefetch = 0 : i64, scratch_operands = 0 : i64, tpu.core_type = #tpu.core_type<tc>, window_params = [{transform_indices = @transform_0, window_bounds = array<i64: 128, 32>}, {transform_indices = @transform_1, window_bounds = array<i64: 128, 12>}, {pipeline_mode = #tpu.pipeline_mode<synchronous>, transform_indices = @transform_2, window_bounds = array<i64: 24, 12>}, {pipeline_mode = #tpu.pipeline_mode<synchronous>, transform_indices = @transform_3, window_bounds = array<i64: 32, 32>}, {pipeline_mode = #tpu.pipeline_mode<synchronous>, transform_indices = @transform_4, window_bounds = array<i64: 32, 8>}, {pipeline_mode = #tpu.pipeline_mode<synchronous>, transform_indices = @transform_5, window_bounds = array<i64: 32, 1>}, {pipeline_mode = #tpu.pipeline_mode<synchronous>, transform_indices = @transform_6, window_bounds = array<i64: 24, 24>}, {pipeline_mode = #tpu.pipeline_mode<synchronous>, transform_indices = @transform_7, window_bounds = array<i64: 24, 24>}, {pipeline_mode = #tpu.pipeline_mode<synchronous>, transform_indices = @transform_8, window_bounds = array<i64: 8, 32>}, {pipeline_mode = #tpu.pipeline_mode<synchronous>, transform_indices = @transform_9, window_bounds = array<i64: 8, 8>}, {pipeline_mode = #tpu.pipeline_mode<synchronous>, transform_indices = @transform_10, window_bounds = array<i64: 8, 1>}, {transform_indices = @transform_11, window_bounds = array<i64: 1, 128>}]} {
    %c0 = arith.constant 0 : index
    %c0_0 = arith.constant 0 : index
    %0 = vector.load %arg1[%c0, %c0_0] : memref<128x32xf32, #tpu.memory_space<vmem>>, vector<128x32xf32>
    %c0_1 = arith.constant 0 : index
    %c0_2 = arith.constant 0 : index
    %1 = vector.load %arg2[%c0_1, %c0_2] : memref<128x12xf32, #tpu.memory_space<vmem>>, vector<128x12xf32>
    %c0_3 = arith.constant 0 : index
    %c0_4 = arith.constant 0 : index
    %2 = vector.load %arg3[%c0_3, %c0_4] : memref<24x12xf32, #tpu.memory_space<vmem>>, vector<24x12xf32>
    %cst = arith.constant dense<0.000000e+00> : vector<24x128xf32>
    %3 = tpu.matmul %2, %1, %cst {dimension_numbers = #tpu.dot_dimension_numbers<[1], [1], [0], [0], [0, 0, 1, 0], [], []>} : vector<24x12xf32>, vector<128x12xf32>, vector<24x128xf32> -> vector<24x128xf32>
    %4 = vector.extract_strided_slice %3 {offsets = [0, 0], sizes = [8, 128], strides = [1, 1]} : vector<24x128xf32> to vector<8x128xf32>
    %5 = vector.extract_strided_slice %3 {offsets = [8, 0], sizes = [8, 128], strides = [1, 1]} : vector<24x128xf32> to vector<8x128xf32>
    %6 = vector.extract_strided_slice %3 {offsets = [16, 0], sizes = [8, 128], strides = [1, 1]} : vector<24x128xf32> to vector<8x128xf32>
    %7 = arith.mulf %4, %4 : vector<8x128xf32>
    %8 = arith.mulf %5, %5 : vector<8x128xf32>
    %9 = arith.addf %7, %8 : vector<8x128xf32>
    %10 = arith.mulf %6, %6 : vector<8x128xf32>
    %11 = arith.addf %9, %10 : vector<8x128xf32>
    %cst_5 = arith.constant 9.99999993E-9 : f32
    %12 = vector.broadcast %cst_5 : f32 to vector<8x128xf32>
    %13 = arith.maximumf %11, %12 : vector<8x128xf32>
    %14 = math.sqrt %13 : vector<8x128xf32>
    %c0_6 = arith.constant 0 : index
    %c0_7 = arith.constant 0 : index
    %15 = vector.load %arg4[%c0_6, %c0_7] : memref<32x32xf32, #tpu.memory_space<vmem>>, vector<32x32xf32>
    %cst_8 = arith.constant dense<0.000000e+00> : vector<32x128xf32>
    %16 = tpu.matmul %15, %0, %cst_8 {dimension_numbers = #tpu.dot_dimension_numbers<[1], [1], [0], [0], [0, 0, 1, 0], [], []>} : vector<32x32xf32>, vector<128x32xf32>, vector<32x128xf32> -> vector<32x128xf32>
    %c0_9 = arith.constant 0 : index
    %c0_10 = arith.constant 0 : index
    %17 = vector.load %arg5[%c0_9, %c0_10] : memref<32x8xf32, #tpu.memory_space<vmem>>, vector<32x8xf32>
    %cst_11 = arith.constant dense<0.000000e+00> : vector<32x128xf32>
    %18 = tpu.matmul %17, %14, %cst_11 {dimension_numbers = #tpu.dot_dimension_numbers<[1], [0], [0], [1], [0, 0, 1, 1], [], []>} : vector<32x8xf32>, vector<8x128xf32>, vector<32x128xf32> -> vector<32x128xf32>
    %19 = arith.addf %16, %18 : vector<32x128xf32>
    %c0_12 = arith.constant 0 : index
    %c0_13 = arith.constant 0 : index
    %20 = vector.load %arg6[%c0_12, %c0_13] : memref<32x1xf32, #tpu.memory_space<vmem>>, vector<32x1xf32>
    %21 = vector.broadcast %20 : vector<32x1xf32> to vector<32x128xf32>
    %22 = arith.addf %19, %21 : vector<32x128xf32>
    %cst_14 = arith.constant 0.000000e+00 : f32
    %23 = vector.broadcast %cst_14 : f32 to vector<32x128xf32>
    %24 = arith.maximumf %22, %23 : vector<32x128xf32>
    %c0_15 = arith.constant 0 : index
    %c0_16 = arith.constant 0 : index
    %25 = vector.load %arg9[%c0_15, %c0_16] : memref<8x32xf32, #tpu.memory_space<vmem>>, vector<8x32xf32>
    %cst_17 = arith.constant dense<0.000000e+00> : vector<8x128xf32>
    %26 = tpu.matmul %25, %24, %cst_17 {dimension_numbers = #tpu.dot_dimension_numbers<[1], [0], [0], [1], [0, 0, 1, 1], [], []>} : vector<8x32xf32>, vector<32x128xf32>, vector<8x128xf32> -> vector<8x128xf32>
    %c0_18 = arith.constant 0 : index
    %c0_19 = arith.constant 0 : index
    %27 = vector.load %arg7[%c0_18, %c0_19] : memref<24x24xf32, #tpu.memory_space<vmem>>, vector<24x24xf32>
    %cst_20 = arith.constant dense<0.000000e+00> : vector<24x128xf32>
    %28 = tpu.matmul %27, %3, %cst_20 {dimension_numbers = #tpu.dot_dimension_numbers<[1], [0], [0], [1], [0, 0, 1, 1], [], []>} : vector<24x24xf32>, vector<24x128xf32>, vector<24x128xf32> -> vector<24x128xf32>
    %29 = vector.extract_strided_slice %28 {offsets = [0, 0], sizes = [8, 128], strides = [1, 1]} : vector<24x128xf32> to vector<8x128xf32>
    %30 = vector.extract_strided_slice %28 {offsets = [8, 0], sizes = [8, 128], strides = [1, 1]} : vector<24x128xf32> to vector<8x128xf32>
    %31 = vector.extract_strided_slice %28 {offsets = [16, 0], sizes = [8, 128], strides = [1, 1]} : vector<24x128xf32> to vector<8x128xf32>
    %32 = arith.mulf %29, %29 : vector<8x128xf32>
    %33 = arith.mulf %30, %30 : vector<8x128xf32>
    %34 = arith.addf %32, %33 : vector<8x128xf32>
    %35 = arith.mulf %31, %31 : vector<8x128xf32>
    %36 = arith.addf %34, %35 : vector<8x128xf32>
    %cst_21 = arith.constant 9.99999993E-9 : f32
    %37 = vector.broadcast %cst_21 : f32 to vector<8x128xf32>
    %38 = arith.maximumf %36, %37 : vector<8x128xf32>
    %39 = math.sqrt %38 : vector<8x128xf32>
    %40 = arith.negf %39 : vector<8x128xf32>
    %41 = math.exp %40 : vector<8x128xf32>
    %cst_22 = arith.constant 1.000000e+00 : f32
    %42 = vector.broadcast %cst_22 : f32 to vector<8x128xf32>
    %43 = arith.addf %42, %41 : vector<8x128xf32>
    %44 = arith.divf %42, %43 : vector<8x128xf32>
    %45 = tpu.concatenate %44, %44, %44 in 0 : vector<8x128xf32>, vector<8x128xf32>, vector<8x128xf32> -> vector<24x128xf32>
    %46 = arith.mulf %28, %45 : vector<24x128xf32>
    %c0_23 = arith.constant 0 : index
    %c0_24 = arith.constant 0 : index
    %47 = vector.load %arg8[%c0_23, %c0_24] : memref<24x24xf32, #tpu.memory_space<vmem>>, vector<24x24xf32>
    %cst_25 = arith.constant dense<0.000000e+00> : vector<24x128xf32>
    %48 = tpu.matmul %47, %46, %cst_25 {dimension_numbers = #tpu.dot_dimension_numbers<[1], [0], [0], [1], [0, 0, 1, 1], [], []>} : vector<24x24xf32>, vector<24x128xf32>, vector<24x128xf32> -> vector<24x128xf32>
    %49 = vector.extract_strided_slice %48 {offsets = [0, 0], sizes = [8, 128], strides = [1, 1]} : vector<24x128xf32> to vector<8x128xf32>
    %50 = vector.extract_strided_slice %48 {offsets = [8, 0], sizes = [8, 128], strides = [1, 1]} : vector<24x128xf32> to vector<8x128xf32>
    %51 = vector.extract_strided_slice %48 {offsets = [16, 0], sizes = [8, 128], strides = [1, 1]} : vector<24x128xf32> to vector<8x128xf32>
    %52 = arith.mulf %49, %49 : vector<8x128xf32>
    %53 = arith.mulf %50, %50 : vector<8x128xf32>
    %54 = arith.addf %52, %53 : vector<8x128xf32>
    %55 = arith.mulf %51, %51 : vector<8x128xf32>
    %56 = arith.addf %54, %55 : vector<8x128xf32>
    %cst_26 = arith.constant 9.99999993E-9 : f32
    %57 = vector.broadcast %cst_26 : f32 to vector<8x128xf32>
    %58 = arith.maximumf %56, %57 : vector<8x128xf32>
    %59 = math.sqrt %58 : vector<8x128xf32>
    %c0_27 = arith.constant 0 : index
    %c0_28 = arith.constant 0 : index
    %60 = vector.load %arg10[%c0_27, %c0_28] : memref<8x8xf32, #tpu.memory_space<vmem>>, vector<8x8xf32>
    %cst_29 = arith.constant dense<0.000000e+00> : vector<8x128xf32>
    %61 = tpu.matmul %60, %59, %cst_29 {dimension_numbers = #tpu.dot_dimension_numbers<[1], [0], [0], [1], [0, 0, 1, 1], [], []>} : vector<8x8xf32>, vector<8x128xf32>, vector<8x128xf32> -> vector<8x128xf32>
    %62 = arith.addf %26, %61 : vector<8x128xf32>
    %c0_30 = arith.constant 0 : index
    %c0_31 = arith.constant 0 : index
    %63 = vector.load %arg11[%c0_30, %c0_31] : memref<8x1xf32, #tpu.memory_space<vmem>>, vector<8x1xf32>
    %64 = vector.broadcast %63 : vector<8x1xf32> to vector<8x128xf32>
    %65 = arith.addf %62, %64 : vector<8x128xf32>
    %66 = vector.extract_strided_slice %65 {offsets = [0, 0], sizes = [1, 128], strides = [1, 1]} : vector<8x128xf32> to vector<1x128xf32>
    %c0_32 = arith.constant 0 : index
    %c0_33 = arith.constant 0 : index
    %67 = vector.load %arg12[%c0_32, %c0_33] : memref<1x128xf32, #tpu.memory_space<vmem>>, vector<1x128xf32>
    tpu.vector_store %arg12[%c0_32, %c0_33], %66 {strides = array<i32>} : memref<1x128xf32, #tpu.memory_space<vmem>>, vector<1x128xf32>,
    return
  }
  func.func @transform_0(%arg0: i32) -> (i32, i32) {
    %c0_i32 = arith.constant 0 : i32
    %c0_i32_0 = arith.constant 0 : i32
    return %arg0, %c0_i32 : i32, i32
  }
  func.func @transform_1(%arg0: i32) -> (i32, i32) {
    %c0_i32 = arith.constant 0 : i32
    %c0_i32_0 = arith.constant 0 : i32
    return %arg0, %c0_i32 : i32, i32
  }
  func.func @transform_2(%arg0: i32) -> (i32, i32) {
    %c0_i32 = arith.constant 0 : i32
    %c0_i32_0 = arith.constant 0 : i32
    %c0_i32_1 = arith.constant 0 : i32
    return %c0_i32, %c0_i32_0 : i32, i32
  }
  func.func @transform_3(%arg0: i32) -> (i32, i32) {
    %c0_i32 = arith.constant 0 : i32
    %c0_i32_0 = arith.constant 0 : i32
    %c0_i32_1 = arith.constant 0 : i32
    return %c0_i32, %c0_i32_0 : i32, i32
  }
  func.func @transform_4(%arg0: i32) -> (i32, i32) {
    %c0_i32 = arith.constant 0 : i32
    %c0_i32_0 = arith.constant 0 : i32
    %c0_i32_1 = arith.constant 0 : i32
    return %c0_i32, %c0_i32_0 : i32, i32
  }
  func.func @transform_5(%arg0: i32) -> (i32, i32) {
    %c0_i32 = arith.constant 0 : i32
    %c0_i32_0 = arith.constant 0 : i32
    %c0_i32_1 = arith.constant 0 : i32
    return %c0_i32, %c0_i32_0 : i32, i32
  }
  func.func @transform_6(%arg0: i32) -> (i32, i32) {
    %c0_i32 = arith.constant 0 : i32
    %c0_i32_0 = arith.constant 0 : i32
    %c0_i32_1 = arith.constant 0 : i32
    return %c0_i32, %c0_i32_0 : i32, i32
  }
  func.func @transform_7(%arg0: i32) -> (i32, i32) {
    %c0_i32 = arith.constant 0 : i32
    %c0_i32_0 = arith.constant 0 : i32
    %c0_i32_1 = arith.constant 0 : i32
    return %c0_i32, %c0_i32_0 : i32, i32
  }
  func.func @transform_8(%arg0: i32) -> (i32, i32) {
    %c0_i32 = arith.constant 0 : i32
    %c0_i32_0 = arith.constant 0 : i32
    %c0_i32_1 = arith.constant 0 : i32
    return %c0_i32, %c0_i32_0 : i32, i32
  }
  func.func @transform_9(%arg0: i32) -> (i32, i32) {
    %c0_i32 = arith.constant 0 : i32
    %c0_i32_0 = arith.constant 0 : i32
    %c0_i32_1 = arith.constant 0 : i32
    return %c0_i32, %c0_i32_0 : i32, i32
  }
  func.func @transform_10(%arg0: i32) -> (i32, i32) {
    %c0_i32 = arith.constant 0 : i32
    %c0_i32_0 = arith.constant 0 : i32
    %c0_i32_1 = arith.constant 0 : i32
    return %c0_i32, %c0_i32_0 : i32, i32
  }
  func.func @transform_11(%arg0: i32) -> (i32, i32) {
    %c0_i32 = arith.constant 0 : i32
    %c0_i32_0 = arith.constant 0 : i32
    return %c0_i32, %arg0 : i32, i32
  }
}

</mosaic_0001>

<bundles_post_ra>
// kernel: tpu_custom_call.1
= control target key start
LH: loop header
LB: loop body
LE: loop exit
PB: predicated region body
PF: predicated region fallthrough
CT: control target
= control target key end

     0   :  { %vm74_vm0 = vcmask 97280   ;;  %v1284_v2 = vmov 0.0|0.0   ;;  %vm1285_vm2 = vmmov 0   ;;  %v1286_v5 = vmov 0.0   ;;  %s1663_s0 = inlined_call_operand.vmem [shape: f32[8,32], index: 0, kind: input, shape index: {}]   ;;  %s1664_s1 = inlined_call_operand.vmem [shape: f32[8,12], index: 1, kind: input, shape index: {}]   ;;  %s1665_s2 = inlined_call_operand.vmem [shape: f32[24,12], index: 2, kind: input, shape index: {}]   ;;  %s1666_s3 = inlined_call_operand.vmem [shape: f32[32,32], index: 3, kind: input, shape index: {}]   ;;  %s1667_s4 = inlined_call_operand.vmem [shape: f32[32,8], index: 4, kind: input, shape index: {}]   ;;  %s1668_s5 = inlined_call_operand.vmem [shape: f32[32,1], index: 5, kind: input, shape index: {}]   ;;  %s1669_s6 = inlined_call_operand.vmem [shape: f32[24,24], index: 6, kind: input, shape index: {}]   ;;  %s1670_s7 = inlined_call_operand.vmem [shape: f32[24,24], index: 7, kind: input, shape index: {}]   ;;  %s1671_s8 = inlined_call_operand.vmem [shape: f32[8,32], index: 8, kind: input, shape index: {}]   ;;  %s1672_s9 = inlined_call_operand.vmem [shape: f32[8,8], index: 9, kind: input, shape index: {}]   ;;  %s1673_s10 = inlined_call_operand.vmem [shape: f32[8,1], index: 10, kind: input, shape index: {}]   ;;  %s1674_s11 = inlined_call_operand.hbm [shape: f32[1,8], index: 11, kind: output, shape index: {}]  }
   0x1   :  { %v55_v0 = vld [vmem:[%s1664_s1] sm:$0xff]  ;;  %v56_v1 = vld [vmem:[%s1664_s1 + $0x8] sm:$0xff]  ;;  %1147 = vmatprep.subr.bf16.mxu0 %v1284_v2  ;;  %vm1358_vm1 = vmpackc.low %vm74_vm0, %vm74_vm0  ;;  %1046 = vmatprep.mubr.msk.f32.mxu0 %vm1285_vm2, %v1286_v5 }
   0x2   :  { %v1148_v3 = vpack.c.bf16 %v56_v1, %v55_v0  ;;  %v57_v6 = vld [vmem:[%s1664_s1 + $0x10] sm:$0xff]  ;;  %v58_v7 = vld [vmem:[%s1664_s1 + $0x18] sm:$0xff] }
   0x4   :  { %1150 = vmatpush3.bf16.xpose.msk.msra.mxu0 %vm1358_vm1, %v1148_v3 }
   0x5   :  { %1151 = vmatprep.subr.bf16.mxu0 %v1284_v2 }
   0x6   :  { %16 = vsyncpa [#allocation3], 0  ;;  %v1152_v8 = vpack.c.bf16 %v58_v7, %v57_v6  ;;  %v59_v9 = vld [vmem:[%s1664_s1 + $0x20] sm:$0xff]  ;;  %v60_v10 = vld [vmem:[%s1664_s1 + $0x28] sm:$0xff]  ;;  %vm233_vm3 = vcmask 64512   ;;  %v1287_v33 = vmov 0  }
   0x7   :  { %v1156_v11 = vpack.c.bf16 %v60_v10, %v59_v9  ;;  %v61_v12 = vld [vmem:[%s1664_s1 + $0x30] sm:$0xff]  ;;  %v62_v13 = vld [vmem:[%s1664_s1 + $0x38] sm:$0xff]  ;;  %v63_v15 = vld [vmem:[%s1664_s1 + $0x40] sm:$0xff]  ;;  %1248 = vset.pattern.permute.xlu0 %v1287_v33  ;;  %1249 = vset.pattern.permute.xlu1 %v1287_v33  ;;  %vm331_vm4 = vcmask 261120   ;;  %vm513_vm8 = vcmask 195584   ;;  %s1288_s16 = smov [#allocation2]  }
   0x8   :  { %v1160_v14 = vpack.c.bf16 %v62_v13, %v61_v12  ;;  %v64_v16 = vld [vmem:[%s1664_s1 + $0x48] sm:$0xff]  ;;  %v65_v18 = vld [vmem:[%s1664_s1 + $0x50] sm:$0xff]  ;;  %v66_v19 = vld [vmem:[%s1664_s1 + $0x58] sm:$0xff]  ;;  %s891_s17 = sshll.u32 %s1288_s16, 4  ;;  %s892_s17 = int_to_ptr.vmem [resolvable:$true] %s891_s17 }
   0x9   :  { %v1164_v17 = vpack.c.bf16 %v64_v16, %v63_v15  ;;  %v1168_v20 = vpack.c.bf16 %v66_v19, %v65_v18  ;;  %v67_v21 = vld [vmem:[%s1664_s1 + $0x60] sm:$0xff]  ;;  %v68_v22 = vld [vmem:[%s1664_s1 + $0x68] sm:$0xff]  ;;  %v69_v24 = vld [vmem:[%s1664_s1 + $0x70] sm:$0xff]  ;;  %s1260_s18 = scalar_lea.vmem %s892_s17, 16  ;;  %s1264_s19 = scalar_lea.vmem %s892_s17, 32 }
   0xa   :  { %v1172_v23 = vpack.c.bf16 %v68_v22, %v67_v21  ;;  %v70_v25 = vld [vmem:[%s1664_s1 + $0x78] sm:$0xff]  ;;  %v71_v27 = vld [vmem:[%s1665_s2] sm:$0xff]  ;;  %v72_v28 = vld [vmem:[%s1665_s2 + $0x8] sm:$0xff]  ;;  %p1261_p0 = scmp.ne.s32.totalorder %s892_s17, %s1260_s18  ;;  %p1265_p1 = scmp.lt.s32.totalorder %s892_s17, %s892_s17 }
   0xb   :  { %v1176_v26 = vpack.c.bf16 %v70_v25, %v69_v24  ;;  %v73_v29 = vld [vmem:[%s1665_s2 + $0x10] sm:$0xff]  ;;  %v229_v30 = vld [vmem:[%s1667_s4] sm:$0xff]  ;;  %v478_v34 = vld [vmem:[%s1668_s5 + $0x8] sm:$0xff]  ;;  %p1266_p2 = scmp.lt.s32.totalorder %s1264_s19, %s1260_s18 }
   0xc   :  { %1154 = vmatpush3.bf16.xpose.msk.msra.mxu0 %vm1358_vm1, %v1152_v8  ;;  %1057 = vmatprep.mubr.msk.f32.mxu1 %vm233_vm3, %v229_v30  ;;  %v477_v31 = vld [vmem:[%s1668_s5] sm:$0xff]  ;;  %v479_v32 = vld [vmem:[%s1668_s5 + $0x10] sm:$0xff]  ;;  %v480_v35 = vld [vmem:[%s1668_s5 + $0x18] sm:$0xff] }
   0xd   :  { %1155 = vmatprep.subr.bf16.mxu0 %v1284_v2  ;;  %483 = vperm.xlu0 %1248, %v477_v31   ;;  %v39_v50 = vld [vmem:[%s1663_s0] sm:$0xff]  ;;  %v40_v51 = vld [vmem:[%s1663_s0 + $0x8] sm:$0xff]  ;;  %vm1486_vm7 = vmpackc.low %vm331_vm4, %vm331_vm4  ;;  %p1267_p3 = por %p1266_p2, %p1265_p1 }
   0xe   :  { %493 = vperm.xlu1 %1249, %v479_v32   ;;  %v1179_v55 = vpack.c.bf16 %v40_v51, %v39_v50  ;;  %v230_v58 = vld [vmem:[%s1667_s4 + $0x8] sm:$0xff]  ;;  %v231_v59 = vld [vmem:[%s1667_s4 + $0x10] sm:$0xff]  ;;  %v42_v61 = vld [vmem:[%s1663_s0 + $0x18] sm:$0xff] }
   0xf   :  { %v41_v60 = vld [vmem:[%s1663_s0 + $0x10] sm:$0xff]  ;;  %v232_v62 = vld [vmem:[%s1667_s4 + $0x18] sm:$0xff]  ;;  %v225_v63 = vld [vmem:[%s1666_s3] sm:$0xff]  ;;  %p1268_p4 = pnand %p1267_p3, %p1261_p0 }
  0x10   :  { %v1185_v0 = vpack.c.bf16 %v42_v61, %v41_v60  ;;  %v43_v1 = vld [vmem:[%s1663_s0 + $0x20] sm:$0xff]  ;;  %v44_v3 = vld [vmem:[%s1663_s0 + $0x28] sm:$0xff]  ;;  %v45_v6 = vld [vmem:[%s1663_s0 + $0x30] sm:$0xff] }
  0x11   :  { %488 = vperm.xlu0 %1248, %v478_v34   ;;  %v1191_v4 = vpack.c.bf16 %v44_v3, %v43_v1  ;;  %v46_v7 = vld [vmem:[%s1663_s0 + $0x38] sm:$0xff]  ;;  %v47_v9 = vld [vmem:[%s1663_s0 + $0x40] sm:$0xff]  ;;  %v48_v10 = vld [vmem:[%s1663_s0 + $0x48] sm:$0xff] }
  0x12   :  { %498 = vperm.xlu1 %1249, %v480_v35   ;;  %v1197_v8 = vpack.c.bf16 %v46_v7, %v45_v6  ;;  %v49_v12 = vld [vmem:[%s1663_s0 + $0x50] sm:$0xff]  ;;  %v50_v13 = vld [vmem:[%s1663_s0 + $0x58] sm:$0xff]  ;;  %v51_v15 = vld [vmem:[%s1663_s0 + $0x60] sm:$0xff] }
  0x13   :  { %v52_v16 = vld [vmem:[%s1663_s0 + $0x68] sm:$0xff]  ;;  %v53_v18 = vld [vmem:[%s1663_s0 + $0x70] sm:$0xff]  ;;  %v54_v19 = vld [vmem:[%s1663_s0 + $0x78] sm:$0xff] }
  0x14   :  { %1158 = vmatpush3.bf16.xpose.msk.msra.mxu0 %vm1358_vm1, %v1156_v11  ;;  %v1203_v11 = vpack.c.bf16 %v48_v10, %v47_v9  ;;  %v226_v21 = vld [vmem:[%s1666_s3 + $0x8] sm:$0xff]  ;;  %v227_v22 = vld [vmem:[%s1666_s3 + $0x10] sm:$0xff]  ;;  %v510_v24 = vld [vmem:[%s1669_s6] sm:$0xff] }
  0x15   :  { %1159 = vmatprep.subr.bf16.mxu0 %v1284_v2  ;;  %v511_v25 = vld [vmem:[%s1669_s6 + $0x8] sm:$0xff]  ;;  %v625_v9 = vld [vmem:[%s1670_s7] sm:$0xff] }
  0x16   :  { %v626_v10 = vld [vmem:[%s1670_s7 + $0x8] sm:$0xff] }
  0x1c   :  { %1162 = vmatpush3.bf16.xpose.msk.msra.mxu0 %vm1358_vm1, %v1160_v14  ;;  %v1209_v14 = vpack.c.bf16 %v50_v13, %v49_v12  ;;  %v509_v12 = vld [vmem:[%s1671_s8] sm:$0xff] }
  0x1d   :  { %1163 = vmatprep.subr.bf16.mxu0 %v1284_v2 }
  0x24   :  { %1166 = vmatpush3.bf16.xpose.msk.msra.mxu0 %vm1358_vm1, %v1164_v17  ;;  %v1215_v17 = vpack.c.bf16 %v52_v16, %v51_v15 }
  0x25   :  { %1167 = vmatprep.subr.bf16.mxu0 %v1284_v2 }
  0x2c   :  { %1170 = vmatpush3.bf16.xpose.msk.msra.mxu0 %vm1358_vm1, %v1168_v20  ;;  %v1221_v20 = vpack.c.bf16 %v54_v19, %v53_v18 }
  0x2d   :  { %1171 = vmatprep.subr.bf16.mxu0 %v1284_v2 }
  0x34   :  { %1174 = vmatpush3.bf16.xpose.msk.msra.mxu0 %vm1358_vm1, %v1172_v23  ;;  %v228_v23 = vld [vmem:[%s1666_s3 + $0x18] sm:$0xff] }
  0x35   :  { %1175 = vmatprep.subr.bf16.mxu0 %v1284_v2 }
  0x3c   :  { %1178 = vmatpush3.bf16.xpose.msk.msra.mxu0 %vm1358_vm1, %v1176_v26  ;;  %v512_v26 = vld [vmem:[%s1669_s6 + $0x10] sm:$0xff] }
  0x3d   :  { %1230 = vmatprep.subr.bf16.mxu0 %v1284_v2 }
  0x43   :  { %1047 = vmatmul.mubr.msk.f32.vlgmr.msra.gmra.mrb[0].mxu0 %vm74_vm0, %v71_v27  ;;  %v877_v27 = vld [vmem:[%s1673_s10] sm:$0xff] }
  0x44   :  { %1049 = vmatprep.mubr.msk.f32.mxu0 %vm1285_vm2, %v1286_v5  ;;  %880 = vperm.xlu0 %1248, %v877_v27   ;;  %v730_v27 = vld [vmem:[%s1672_s9] sm:$0xff] }
  0x47   :  { %1050 = vmatmul.mubr.msk.f32.gmra.mrb[2].mxu0 %vm74_vm0, %v72_v28 }
  0x48   :  { %1052 = vmatprep.mubr.msk.f32.mxu0 %vm1285_vm2, %v1286_v5 }
  0x4b   :  { %1053 = vmatmul.mubr.msk.f32.gmra.mrb[4].mxu0 %vm74_vm0, %v73_v29 }
  0x4c   :  { %1122 = vmatprep.mubr.msk.f32.mxu0 %vm1285_vm2, %v1286_v5 }
  0x8c   :  { %v484_v28 = vpop.permute.xlu0 %483 }
  0x8d   :  { %v494_v29 = vpop.permute.xlu1 %493 }
  0x90   :  { %v489_v30 = vpop.permute.xlu0 %488 }
  0x91   :  { %v499_v35 = vpop.permute.xlu1 %498 }
 0x116   :  { %v1464_v36 = vpop.f32.mrb[0].mxu0 }
 0x117   :  { %v1048_v37 = vpop.f32.mrb[1].mxu0  ;;  %v212_v39 = vmul.f32 %v1464_v36, %v1464_v36 }
 0x11a   :  { %v1466_v38 = vpop.f32.mrb[2].mxu0 }
 0x11b   :  { %v213_v40 = vmul.f32 %v1466_v38, %v1466_v38  ;;  %v1228_v41 = vpack.c.bf16 %v1466_v38, %v1464_v36  ;;  %v1051_v42 = vpop.f32.mrb[3].mxu0 }
 0x11d   :  { %v214_v43 = vadd.f32 %v213_v40, %v212_v39 }
 0x11e   :  { %v1474_v44 = vpop.f32.mrb[4].mxu0 }
 0x11f   :  { %v215_v45 = vmul.f32 %v1474_v44, %v1474_v44  ;;  %v1054_v46 = vpop.f32.mrb[5].mxu0 }
 0x121   :  { %v216_v47 = vadd.f32 %v215_v45, %v214_v43 }
 0x123   :  { %v217_v48 = vmax.f32 %v216_v47, 1e-08 }
 0x125   :  { %1250 = vrsqrt.f32 %v217_v48  ;;  %vm220_vm5 = vcmp.eq.f32.partialorder %v217_v48, inf  ;;  %v223_v53 = vand.u32 2147483648, %v217_v48  ;;  %vm222_vm6 = vcmp.eq.f32.partialorder %v217_v48, 0.0 }
 0x12f   :  { %v1251_v49 = vpop.eup %1250 }
 0x130   :  { %v219_v52 = vmul.f32 %v1251_v49, %v217_v48 }
 0x132   :  { %v221_v54 = vsel %vm220_vm5, %v217_v48, %v219_v52 }
 0x133   :  { %v224_v56 = vsel %vm222_vm6, %v223_v53, %v221_v54 }
 0x134   :  { %1055 = vmatprep.subr.mxu1 %v224_v56 }
 0x135   :  { %1056 = vmatpush3.msra.mxu1 %v224_v56 }
 0x136   :  { %1181 = vmatprep.subr.msk.bf16.mxu1 %vm1486_vm7, %v1179_v55  ;;  %1058 = vmatmul.mubr.msk.f32.vlgmr.msra.gmra.mrb[0].mxu1 %vm233_vm3, %v230_v58 }
 0x137   :  { %1060 = vmatprep.mubr.msk.f32.mxu1 %vm233_vm3, %v231_v59 }
 0x13a   :  { %1061 = vmatmul.mubr.msk.f32.gmra.mrb[2].mxu1 %vm233_vm3, %v232_v62 }
 0x13b   :  { %1095 = vmatprep.mubr.msk.f32.mxu1 %vm331_vm4, %v225_v63 }
 0x13c   :  { %1184 = vmatpush3.bf16.xpose.msk.msra.mxu1 %vm1486_vm7, %v1179_v55 }
 0x13d   :  { %1187 = vmatprep.subr.msk.bf16.mxu1 %vm1486_vm7, %v1185_v0 }
 0x144   :  { %1190 = vmatpush3.bf16.xpose.msk.msra.mxu1 %vm1486_vm7, %v1185_v0 }
 0x145   :  { %1193 = vmatprep.subr.msk.bf16.mxu1 %vm1486_vm7, %v1191_v4 }
 0x14c   :  { %1196 = vmatpush3.bf16.xpose.msk.msra.mxu1 %vm1486_vm7, %v1191_v4 }
 0x14d   :  { %1199 = vmatprep.subr.msk.bf16.mxu1 %vm1486_vm7, %v1197_v8 }
 0x154   :  { %1202 = vmatpush3.bf16.xpose.msk.msra.mxu1 %vm1486_vm7, %v1197_v8 }
 0x155   :  { %1205 = vmatprep.subr.msk.bf16.mxu1 %vm1486_vm7, %v1203_v11 }
 0x15c   :  { %1208 = vmatpush3.bf16.xpose.msk.msra.mxu1 %vm1486_vm7, %v1203_v11  ;;  %v627_v11 = vld [vmem:[%s1670_s7 + $0x10] sm:$0xff] }
 0x15d   :  { %1211 = vmatprep.subr.msk.bf16.mxu1 %vm1486_vm7, %v1209_v14 }
 0x164   :  { %1214 = vmatpush3.bf16.xpose.msk.msra.mxu1 %vm1486_vm7, %v1209_v14 }
 0x165   :  { %1217 = vmatprep.subr.msk.bf16.mxu1 %vm1486_vm7, %v1215_v17 }
 0x16c   :  { %1220 = vmatpush3.bf16.xpose.msk.msra.mxu1 %vm1486_vm7, %v1215_v17 }
 0x16d   :  { %1223 = vmatprep.subr.msk.bf16.mxu1 %vm1486_vm7, %v1221_v20 }
 0x174   :  { %1226 = vmatpush3.bf16.xpose.msk.msra.mxu1 %vm1486_vm7, %v1221_v20 }
 0x175   :  { %1227 = vmatprep.subr.bf16.mxu1 %v1284_v2 }
 0x17b   :  { %1096 = vmatmul.mubr.msk.f32.vlgmr.msra.gmra.mrb[0].mxu1 %vm331_vm4, %v226_v21 }
 0x17c   :  { %1229 = vmatpush3.bf16.msra.mxu1 %v1228_v41  ;;  %1098 = vmatprep.mubr.msk.f32.mxu1 %vm331_vm4, %v227_v22 }
 0x17d   :  { %1105 = vmatprep.subr.mxu1 %v1286_v5 }
 0x17f   :  { %1099 = vmatmul.mubr.msk.f32.gmra.mrb[2].mxu1 %vm331_vm4, %v228_v23 }
 0x180   :  { %1106 = vmatpush3.msra.mxu1 %v1474_v44  ;;  %1107 = vmatprep.mubr.msk.f32.mxu1 %vm1285_vm2, %v1286_v5 }
 0x181   :  { %1131 = vmatprep.subr.mxu1 %v1286_v5 }
 0x183   :  { %1108 = vmatmul.mubr.msk.f32.vlgmr.msra.gmra.mrb[4].mxu1 %vm513_vm8, %v510_v24 }
 0x184   :  { %1110 = vmatprep.mubr.msk.f32.mxu1 %vm1285_vm2, %v1286_v5 }
 0x187   :  { %1111 = vmatmul.mubr.msk.f32.gmra.mrb[6].mxu1 %vm513_vm8, %v511_v25 }
 0x188   :  { %1113 = vmatprep.mubr.msk.f32.mxu1 %vm1285_vm2, %v1286_v5 }
 0x18b   :  { %1114 = vmatmul.mubr.msk.f32.gmra.mrb[8].mxu1 %vm513_vm8, %v512_v26 }
 0x18c   :  { %1133 = vmatprep.mubr.msk.f32.mxu1 %vm1285_vm2, %v1286_v5 }
 0x24e   :  { %v1097_v31 = vpop.f32.mrb[0].mxu1 }
 0x24f   :  { %v502_v32 = vadd.f32 %v1097_v31, %v489_v30  ;;  %v458_v33 = vpop.f32.mrb[1].mxu1 }
 0x250   :  { %v501_v34 = vadd.f32 %v484_v28, %v458_v33 }
 0x251   :  { %v506_v36 = vmax.f32 %v502_v32, 0.0 }
 0x252   :  { %v505_v37 = vmax.f32 %v501_v34, 0.0  ;;  %v1100_v38 = vpop.f32.mrb[2].mxu1  ;;  %v881_v34 = vpop.permute.xlu0 %880 }
 0x253   :  { %v504_v39 = vadd.f32 %v1100_v38, %v499_v35  ;;  %v468_v40 = vpop.f32.mrb[3].mxu1 }
 0x254   :  { %v1234_v41 = vpack.c.bf16 %v506_v36, %v505_v37  ;;  %v503_v42 = vadd.f32 %v494_v29, %v468_v40 }
 0x255   :  { %v508_v43 = vmax.f32 %v504_v39, 0.0 }
 0x256   :  { %v507_v44 = vmax.f32 %v503_v42, 0.0  ;;  %v589_v45 = vpop.f32.mrb[4].mxu1 }
 0x257   :  { %v1109_v46 = vpop.f32.mrb[5].mxu1  ;;  %v603_v49 = vmul.f32 %v589_v45, %v589_v45 }
 0x258   :  { %v1237_v47 = vpack.c.bf16 %v508_v43, %v507_v44 }
 0x25a   :  { %v594_v48 = vpop.f32.mrb[6].mxu1 }
 0x25b   :  { %v604_v50 = vmul.f32 %v594_v48, %v594_v48  ;;  %v1112_v51 = vpop.f32.mrb[7].mxu1 }
 0x25d   :  { %v605_v52 = vadd.f32 %v604_v50, %v603_v49 }
 0x25e   :  { %v599_v53 = vpop.f32.mrb[8].mxu1 }
 0x25f   :  { %v606_v54 = vmul.f32 %v599_v53, %v599_v53  ;;  %v1115_v55 = vpop.f32.mrb[9].mxu1 }
 0x261   :  { %v607_v56 = vadd.f32 %v606_v54, %v605_v52 }
 0x263   :  { %v608_v57 = vmax.f32 %v607_v56, 1e-08 }
 0x265   :  { %1252 = vrsqrt.f32 %v608_v57  ;;  %vm611_vm9 = vcmp.eq.f32.partialorder %v608_v57, inf  ;;  %v614_v60 = vand.u32 2147483648, %v608_v57  ;;  %vm613_vm10 = vcmp.eq.f32.partialorder %v608_v57, 0.0 }
 0x26f   :  { %v1253_v58 = vpop.eup %1252 }
 0x270   :  { %v610_v59 = vmul.f32 %v1253_v58, %v608_v57 }
 0x272   :  { %v612_v61 = vsel %vm611_vm9, %v608_v57, %v610_v59 }
 0x273   :  { %v615_v62 = vsel %vm613_vm10, %v614_v60, %v612_v61 }
 0x274   :  { %v945_v63 = vmul.f32 -1.442695, %v615_v62 }
 0x276   :  { %1254 = vpow2.f32 %v945_v63 }
 0x280   :  { %v1255_v0 = vpop.eup %1254 }
 0x281   :  { %v619_v1 = vadd.f32 1.0, %v1255_v0 }
 0x283   :  { %1256 = vrcp.f32 %v619_v1 }
 0x28d   :  { %v1257_v3 = vpop.eup %1256 }
 0x28e   :  { %v624_v4 = vmul.f32 %v1257_v3, %v599_v53  ;;  %v622_v6 = vmul.f32 %v1257_v3, %v589_v45  ;;  %v623_v7 = vmul.f32 %v1257_v3, %v594_v48 }
 0x290   :  { %v1231_v8 = vpack.c.bf16 %v623_v7, %v622_v6 }
 0x292   :  { %1232 = vmatpush3.bf16.msra.mxu0 %v1231_v8 }
 0x293   :  { %1120 = vmatprep.subr.mxu0 %v1286_v5 }
 0x296   :  { %1121 = vmatpush3.msra.mxu0 %v624_v4 }
 0x297   :  { %1123 = vmatmul.mubr.msk.f32.vlgmr.msra.gmra.mrb[6].mxu0 %vm513_vm8, %v625_v9  ;;  %1233 = vmatprep.subr.bf16.mxu0 %v1284_v2 }
 0x298   :  { %1235 = vmatpush3.bf16.msra.mxu0 %v1234_v41  ;;  %1125 = vmatprep.mubr.msk.f32.mxu0 %vm1285_vm2, %v1286_v5 }
 0x299   :  { %1236 = vmatprep.subr.bf16.mxu0 %v1284_v2 }
 0x29b   :  { %1126 = vmatmul.mubr.msk.f32.gmra.mrb[8].mxu0 %vm513_vm8, %v626_v10 }
 0x29c   :  { %1238 = vmatpush3.bf16.msra.mxu0 %v1237_v47  ;;  %1128 = vmatprep.mubr.msk.f32.mxu0 %vm1285_vm2, %v1286_v5 }
 0x29f   :  { %1129 = vmatmul.mubr.msk.f32.gmra.mrb[10].mxu0 %vm513_vm8, %v627_v11 }
 0x2a0   :  { %1144 = vmatprep.mubr.msk.f32.mxu0 %vm1285_vm2, %v1286_v5 }
 0x2a3   :  { %1145 = vmatmul.mubr.msk.f32.vlgmr.msra.gmra.mrb[12].mxu0 %vm331_vm4, %v509_v12 }
 0x36a   :  { %v703_v2 = vpop.f32.mrb[6].mxu0 }
 0x36b   :  { %v1124_v13 = vpop.f32.mrb[7].mxu0  ;;  %v717_v15 = vmul.f32 %v703_v2, %v703_v2 }
 0x36e   :  { %v708_v14 = vpop.f32.mrb[8].mxu0 }
 0x36f   :  { %v718_v16 = vmul.f32 %v708_v14, %v708_v14  ;;  %v1127_v17 = vpop.f32.mrb[9].mxu0 }
 0x371   :  { %v719_v18 = vadd.f32 %v718_v16, %v717_v15 }
 0x372   :  { %v713_v19 = vpop.f32.mrb[10].mxu0 }
 0x373   :  { %v720_v20 = vmul.f32 %v713_v19, %v713_v19  ;;  %v1130_v21 = vpop.f32.mrb[11].mxu0 }
 0x375   :  { %v721_v22 = vadd.f32 %v720_v20, %v719_v18 }
 0x376   :  { %v873_v29 = vpop.f32.mrb[12].mxu0 }
 0x377   :  { %v722_v23 = vmax.f32 %v721_v22, 1e-08  ;;  %v1146_v30 = vpop.f32.mrb[13].mxu0 }
 0x379   :  { %1258 = vrsqrt.f32 %v722_v23  ;;  %vm725_vm11 = vcmp.eq.f32.partialorder %v722_v23, inf  ;;  %v728_v25 = vand.u32 2147483648, %v722_v23  ;;  %vm727_vm12 = vcmp.eq.f32.partialorder %v722_v23, 0.0 }
 0x383   :  { %v1259_v5 = vpop.eup %1258 }
 0x384   :  { %v724_v24 = vmul.f32 %v1259_v5, %v722_v23 }
 0x386   :  { %v726_v26 = vsel %vm725_vm11, %v722_v23, %v724_v24 }
 0x387   :  { %v729_v28 = vsel %vm727_vm12, %v728_v25, %v726_v26 }
 0x388   :  { %1132 = vmatpush3.msra.mxu1 %v729_v28 }
 0x389   :  { %1134 = vmatmul.mubr.msk.f32.vlgmr.msra.gmra.mrb[10].mxu1 %vm233_vm3, %v730_v27 }
 0x45c   :  { %v800_v31 = vpop.f32.mrb[10].mxu1 }
 0x45d   :  { %v874_v32 = vadd.f32 %v873_v29, %v800_v31  ;;  %v1135_v33 = vpop.f32.mrb[11].mxu1 }
 0x45f   :  { %v883_v35 = vadd.f32 %v881_v34, %v874_v32 }
 0x461   :  { %884 = vst [vmem:[#allocation2] sm:$0x1] %v883_v35 }
 0x462   :  { %1271 = shalt.err (!%p1268_p4)
}
 0x463   :  { %s1272_s21 = scalar_lea.hbm %s1674_s11, 16 }
 0x464   :  { %p1273_p5 = scmp.ne.s32.totalorder %s1674_s11, %s1272_s21  ;;  %p1276_p6 = scmp.lt.u32.totalorder %s1272_s21, %s1674_s11 }
 0x466   :  { %p1278_p7 = pnand %p1276_p6, %p1273_p5 }
 0x468   :  { %1281 = shalt.err (!%p1278_p7)
}
 0x469   :  { %894 = dma.vmem_to_hbm [thread:$0]  %s892_s17, 16, %s1674_s11, [#allocation3]  }
 0x46a   :  { %1282 = dma.done.wait [#allocation3], 16  }
 0x46b   :  { %1283 = vsyncadd [#allocation3], 4294967280 }
 0x46c   :  { %898 = vsyncpa [#allocation3], 1 }

</bundles_post_ra>
